<compile_context>
chip_gen: v7x
topology: tpu7x:2x2x1
jax: 0.10.0
libtpu: 0.0.40
codegen_flags: <defaults>
</compile_context>

<pallas_src>
import functools
import math

import jax
import jax.numpy as jnp
from jax import lax
from jax.experimental import pallas as pl
from jax.experimental.pallas import tpu as pltpu


# ----------------------------------------------------------------------------
# VMEM-aware tile planning.
# ----------------------------------------------------------------------------
_VMEM_BLOCK_BUDGET = 12 << 20   # double-buffered block budget, safe on v5e/v6e/v7x


def _round_up(x, m):
    return ((x + m - 1) // m) * m


def _plan_gram(B, R, D, forced_tile=None, budget_bytes=_VMEM_BLOCK_BUDGET):
    """Padded column count Bp (multiple of 128) and the column tile for kernel 1."""
    Bp = max(128, _round_up(B, 128))
    if forced_tile is not None:
        assert forced_tile % 128 == 0
        Bp = _round_up(Bp, forced_tile)
        return Bp, forced_tile

    def cost(tn):
        # rows(bf16) + cols(bf16) + inv_row + inv_col + keep(bf16) + out(f32),
        # all double-buffered by the BlockSpec pipeline.
        return 2 * (R * D * 2 + D * tn * 2 + R * 4 + tn * 4 + R * tn * 2 + R * tn * 4)

    # TODO(synk): tile the contraction axis D as well if R*D alone blows VMEM.
    tile = 128
    for m in range(Bp // 128, 0, -1):
        tn = m * 128
        if Bp % tn == 0 and cost(tn) <= budget_bytes:
            tile = tn
            break
    return Bp, tile


def _plan_loss(Bp, R, forced_tile=None, budget_bytes=_VMEM_BLOCK_BUDGET):
    """Column tile for the streaming loss-reduction kernel (kernel 2)."""
    if forced_tile is not None:
        assert forced_tile % 128 == 0 and Bp % forced_tile == 0
        return forced_tile

    def cost(tb):
        return 2 * (R * tb * 4 + R * 4)

    tile = 128
    for m in range(Bp // 128, 0, -1):
        tb = m * 128
        if Bp % tb == 0 and cost(tb) <= budget_bytes:
            tile = tb
            break
    return tile


# ----------------------------------------------------------------------------
# Kernel 1: masked exp(cosine/beta) slab for the 2P gathered rows.
#   out[r, c] = keep[r, c] * exp(inv_row[r] * inv_col[c] * <x_rows[r], x[:, c]> / beta)
# ----------------------------------------------------------------------------
def _slab_kernel(xr_ref, xc_ref, invr_ref, invc_ref, keep_ref, out_ref, *, inv_beta):
    cos = jnp.dot(xr_ref[...], xc_ref[...],
                  preferred_element_type=jnp.float32)          # bf16 MXU, f32 acc
    cos = cos * invr_ref[...] * invc_ref[...]                  # cosine similarity
    out_ref[...] = jnp.exp(cos * inv_beta) * keep_ref[...].astype(jnp.float32)


def _slab_exp_cos(x_rows_bf, xt_bf, inv_rows, inv_cols, keep, beta, col_tile):
    R, D = x_rows_bf.shape
    _, Bp = xt_bf.shape
    assert Bp % col_tile == 0
    kernel = functools.partial(_slab_kernel, inv_beta=1.0 / beta)
    return pl.pallas_call(
        kernel,
        out_shape=jax.ShapeDtypeStruct((R, Bp), jnp.float32),
        grid=(Bp // col_tile,),
        in_specs=[
            pl.BlockSpec((R, D), lambda c: (0, 0)),             # gathered rows (bf16)
            pl.BlockSpec((D, col_tile), lambda c: (0, c)),      # x^T column tile (bf16)
            pl.BlockSpec((R, 1), lambda c: (0, 0)),             # 1/||x_row||
            pl.BlockSpec((1, col_tile), lambda c: (0, c)),      # 1/||x_col||
            pl.BlockSpec((R, col_tile), lambda c: (0, c)),      # keep factor (bf16 0/1)
        ],
        out_specs=pl.BlockSpec((R, col_tile), lambda c: (0, c)),
        compiler_params=pltpu.CompilerParams(
            dimension_semantics=("parallel",),                  # megacore-shardable (v7x)
            vmem_limit_bytes=32 * 1024 * 1024),
    )(x_rows_bf, xt_bf, inv_rows, inv_cols, keep)


# ----------------------------------------------------------------------------
# Kernel 2: hard-negative masked row sums (streamed over column tiles, lane-wide
# partial accumulators) + the (2P, P) cross log-loss reduced to a scalar.
# ----------------------------------------------------------------------------
def _loss_kernel(slab_ref, thr_ref, pos_ref, inc_ref, out_ref, acc_ref, *, num_pairs):
    c = pl.program_id(0)

    @pl.when(c == 0)
    def _():
        acc_ref[...] = jnp.zeros_like(acc_ref)

    v = slab_ref[...]                                          # (2P, tb) f32
    contrib = jnp.where(v >= thr_ref[...], v, 0.0)             # hard negatives only
    tb = contrib.shape[1]                                      # multiple of 128
    # Lane-wide partial sums: pure VPU vreg adds, no per-step cross-lane reduce.
    part = contrib[:, 0:128]
    for kk in range(1, tb // 128):
        part = part + contrib[:, kk * 128:(kk + 1) * 128]
    acc_ref[...] += part                                       # (2P, 128)

    @pl.when(c == pl.num_programs(0) - 1)
    def _():
        # Single cross-lane reduce in the epilogue.
        s = jnp.sum(acc_ref[...], axis=1, keepdims=True)       # (2P, 1): [s_i; s_j]
        h = pos_ref[...]                                        # (1, P)
        # -log(h / (h + s)) == log(h + s) - log(h): no divide, more stable.
        # TODO(synk): tile this (2P, P) broadcast term over rows if P grows very large.
        t = jnp.log(h + s) - jnp.log(h)                         # (2P, P)
        total = jnp.sum(t * inc_ref[...])
        out_ref[...] = jnp.reshape(total / (2.0 * num_pairs), (1, 1))


def _loss_reduce(slab, thr, pos_row, inc_row, num_pairs, col_tile):
    R, Bp = slab.shape
    P = pos_row.shape[1]
    assert Bp % col_tile == 0
    kernel = functools.partial(_loss_kernel, num_pairs=num_pairs)
    loss = pl.pallas_call(
        kernel,
        out_shape=jax.ShapeDtypeStruct((1, 1), jnp.float32),
        grid=(Bp // col_tile,),
        in_specs=[
            pl.BlockSpec((R, col_tile), lambda c: (0, c)),
            pl.BlockSpec((R, 1), lambda c: (0, 0)),
            pl.BlockSpec((1, P), lambda c: (0, 0)),
            pl.BlockSpec((1, P), lambda c: (0, 0)),
        ],
        out_specs=pl.BlockSpec((1, 1), lambda c: (0, 0)),
        scratch_shapes=[pltpu.VMEM((R, 128), jnp.float32)],
        compiler_params=pltpu.CompilerParams(
            dimension_semantics=("arbitrary",),
            vmem_limit_bytes=32 * 1024 * 1024),
    )(slab, thr, pos_row, inc_row)
    return loss[0, 0]


# ----------------------------------------------------------------------------
# Plain-JAX glue: torch-style 'linear' quantile via top_k.
# ----------------------------------------------------------------------------
def _quantile_last(x, q):
    """torch.quantile(x, q, dim=-1) with linear interpolation, via lax.top_k."""
    # TODO(synk): for very large B the top_k over (2P, B) can dominate; switch
    # to lax.approx_max_k or a histogram/bisection threshold if acceptable.
    n = x.shape[-1]
    pos = q * (n - 1)
    lo = int(math.floor(pos))
    hi = int(math.ceil(pos))
    frac = pos - lo
    k = n - lo                              # top_k window reaching asc-rank lo
    top = lax.top_k(x, k)[0]                # descending
    v_lo = top[..., n - 1 - lo]             # ascending rank lo
    v_hi = top[..., n - 1 - hi]             # ascending rank hi
    return v_lo + jnp.float32(frac) * (v_hi - v_lo)


def hard_contrastive_loss_v2(embeddings, positive_pairs,
                             beta=0.2, alpha_neg=0.8, alpha_pos=0.2,
                             *, gram_col_tile=None, loss_col_tile=None):
    x = embeddings.astype(jnp.float32)
    B, D = x.shape
    P = positive_pairs.shape[0]
    ii = positive_pairs[:, 0].astype(jnp.int32)
    jj = positive_pairs[:, 1].astype(jnp.int32)
    rows = jnp.concatenate([ii, jj])                               # (2P,)
    R = 2 * P

    Bp, gram_tile = _plan_gram(B, R, D, forced_tile=gram_col_tile)
    loss_tile = _plan_loss(Bp, R, forced_tile=loss_col_tile)

    # --- cheap plain-JAX prologue (nothing B^2 anywhere) ---------------------
    # 1 / max(||x||, 1e-8) as a single rsqrt (torch cosine_similarity eps).
    inv = lax.rsqrt(jnp.maximum(jnp.sum(x * x, axis=1), 1e-16))    # (B,)
    xb = x.astype(jnp.bfloat16)                                    # bf16 MXU operands
    x_rows_bf = xb[rows]                                           # (2P, D)
    xt_bf = jnp.pad(xb.T, ((0, 0), (0, Bp - B)))                   # (D, Bp)
    inv_rows = inv[rows][:, None]                                  # (2P, 1)
    inv_cols = jnp.pad(inv, (0, Bp - B))[None, :]                  # (1, Bp)

    # (2P, Bp) keep-factor: 0 on the diagonal entry of each gathered row, any
    # pair-masked entry and all padded columns; built with iota compares plus
    # two tiny (2P,P)x(P,Bp) matmuls (handles duplicate pair indices exactly
    # like the torch scatter into the (B,B) mask).
    colid = jnp.arange(Bp, dtype=jnp.int32)
    diag = rows[:, None] == colid[None, :]                         # (2P, Bp)
    a1 = (rows[:, None] == ii[None, :]).astype(jnp.float32)        # (2P, P)
    a2 = (rows[:, None] == jj[None, :]).astype(jnp.float32)        # (2P, P)
    oh_jj = (jj[:, None] == colid[None, :]).astype(jnp.float32)    # (P, Bp)
    oh_ii = (ii[:, None] == colid[None, :]).astype(jnp.float32)    # (P, Bp)
    pair_hit = (a1 @ oh_jj + a2 @ oh_ii) > 0.0
    pad_col = colid[None, :] >= B
    keep = jnp.where(diag | pair_hit | pad_col, 0.0, 1.0).astype(jnp.bfloat16)

    # Kernel 1: masked exp(cos/beta) slab for rows [ii; jj].
    slab = _slab_exp_cos(x_rows_bf, xt_bf, inv_rows, inv_cols, keep,
                         beta, gram_tile)                          # (2P, Bp) f32

    # Positive-pair similarities in f32 (cosine matrix is symmetric, so
    # e[ii, jj] == e[jj, ii] and the torch ij/ji branches coincide exactly).
    xi = x_rows_bf[:P].astype(jnp.float32)
    xj = x_rows_bf[P:].astype(jnp.float32)
    pos = jnp.exp(jnp.sum(xi * xj, axis=1) * inv[ii] * inv[jj] / beta)   # (P,)

    # torch-style 'linear' quantiles (plain JAX; only the true B columns).
    thr_neg = _quantile_last(slab[:, :B], alpha_neg)[:, None]      # (2P, 1)
    thr_pos = _quantile_last(pos, alpha_pos)                       # scalar

    # Static-shape emulation of boolean indexing + zip() truncation: keep the
    # first K selected elements, K = min(|sel_ij|, |sel_ji|) (equal lists here).
    sel = pos <= thr_pos
    k = jnp.minimum(jnp.sum(sel), jnp.sum(sel))
    inc = (sel & (jnp.cumsum(sel) <= k)).astype(jnp.float32)       # (P,)

    # Kernel 2: hard-negative row sums + cross log-loss reduction to a scalar.
    return _loss_reduce(slab, thr_neg, pos.reshape(1, P), inc.reshape(1, P),
                        P, loss_tile)


# ----------------------------------------------------------------------------
# Pure-JAX reference (mirrors the torch module structurally, materializing the
# (B,B) matrix).  It uses the same bf16-operand / f32-accumulate matmul policy
# as the kernel so the discontinuous quantile thresholding does not make the
# check flaky on borderline elements; it shares the quantile helper.
# ----------------------------------------------------------------------------
def _reference(embeddings, positive_pairs, beta=0.2, alpha_neg=0.8, alpha_pos=0.2):
    x = embeddings.astype(jnp.float32)
    B = x.shape[0]
    P = positive_pairs.shape[0]
    ii, jj = positive_pairs[:, 0], positive_pairs[:, 1]
    mask = jnp.eye(B, dtype=bool).at[ii, jj].set(True).at[jj, ii].set(True)
    inv = lax.rsqrt(jnp.maximum(jnp.sum(x * x, axis=1), 1e-16))
    xb = x.astype(jnp.bfloat16)
    cos = jnp.dot(xb, xb.T, preferred_element_type=jnp.float32)
    cos = cos * inv[:, None] * inv[None, :]
    e = jnp.exp(cos / beta)
    em = jnp.where(mask, 0.0, e)
    pos_ij, pos_ji = e[ii, jj], e[jj, ii]
    exp_i, exp_j = em[ii], em[jj]
    ti = _quantile_last(exp_i, alpha_neg)[:, None]
    tj = _quantile_last(exp_j, alpha_neg)[:, None]
    s_i = jnp.sum(jnp.where(exp_i >= ti, exp_i, 0.0), axis=1)
    s_j = jnp.sum(jnp.where(exp_j >= tj, exp_j, 0.0), axis=1)
    sel_ij = pos_ij <= _quantile_last(pos_ij, alpha_pos)
    sel_ji = pos_ji <= _quantile_last(pos_ji, alpha_pos)
    k = jnp.minimum(jnp.sum(sel_ij), jnp.sum(sel_ji))
    inc_ij = (sel_ij & (jnp.cumsum(sel_ij) <= k)).astype(jnp.float32)
    inc_ji = (sel_ji & (jnp.cumsum(sel_ji) <= k)).astype(jnp.float32)
    t_ij = -jnp.log(pos_ij[:, None] / (pos_ij[:, None] + s_i[None, :]))
    t_ji = -jnp.log(pos_ji[:, None] / (pos_ji[:, None] + s_j[None, :]))
    total = jnp.sum(t_ij * inc_ij[:, None]) + jnp.sum(t_ji * inc_ji[:, None])
    return total / (2.0 * P)


if __name__ == "__main__":
    key = jax.random.PRNGKey(0)

    # --- small smoke test (single-step grids) --------------------------------
    B, D = 8, 32
    embeddings = jax.random.normal(key, (B, D), dtype=jnp.float32)
    positive_pairs = jnp.array([[0, 1], [2, 3], [4, 5], [6, 7]], dtype=jnp.int32)

    loss = jax.block_until_ready(hard_contrastive_loss_v2(embeddings, positive_pairs))
    ref = _reference(embeddings, positive_pairs)
    assert jnp.isfinite(loss), "loss is not finite"
    assert jnp.allclose(loss, ref, rtol=1e-3, atol=1e-3), (loss, ref)

    # --- larger test exercising multi-step column grids in both kernels ------
    # Loose tolerance: the hard-negative/positive thresholding is discontinuous,
    # so ulp-level pipeline differences could in principle flip a borderline
    # element; this check guards against gross tiling/accumulation bugs.
    B2, D2, P2 = 512, 128, 32
    k1, _ = jax.random.split(key)
    emb2 = jax.random.normal(k1, (B2, D2), dtype=jnp.float32)
    pairs2 = jnp.stack([jnp.arange(0, 2 * P2, 2), jnp.arange(1, 2 * P2, 2)],
                       axis=1).astype(jnp.int32)
    loss2 = jax.block_until_ready(
        hard_contrastive_loss_v2(emb2, pairs2, gram_col_tile=128, loss_col_tile=128))
    ref2 = _reference(emb2, pairs2)
    assert jnp.isfinite(loss2), "tiled loss is not finite"
    assert jnp.allclose(loss2, ref2, rtol=2e-2, atol=2e-2), (loss2, ref2)

    print("KERNEL_OK")
</pallas_src>

<mosaic_0001>
module attributes {stable_mosaic.version = 11 : i64} {
  func.func @_slab_kernel(%arg0: i32, %arg1: memref<8x32xbf16, #tpu.memory_space<vmem>>, %arg2: memref<32x128xbf16, #tpu.memory_space<vmem>>, %arg3: memref<8x1xf32, #tpu.memory_space<vmem>>, %arg4: memref<1x128xf32, #tpu.memory_space<vmem>>, %arg5: memref<8x128xbf16, #tpu.memory_space<vmem>>, %arg6: memref<8x128xf32, #tpu.memory_space<vmem>>) attributes {dimension_semantics = [#tpu.dimension_semantics<parallel>], iteration_bounds = array<i64: 1>, scalar_prefetch = 0 : i64, scratch_operands = 0 : i64, tpu.core_type = #tpu.core_type<tc>, window_params = [{pipeline_mode = #tpu.pipeline_mode<synchronous>, transform_indices = @transform_0, window_bounds = array<i64: 8, 32>}, {transform_indices = @transform_1, window_bounds = array<i64: 32, 128>}, {pipeline_mode = #tpu.pipeline_mode<synchronous>, transform_indices = @transform_2, window_bounds = array<i64: 8, 1>}, {transform_indices = @transform_3, window_bounds = array<i64: 1, 128>}, {transform_indices = @transform_4, window_bounds = array<i64: 8, 128>}, {transform_indices = @transform_5, window_bounds = array<i64: 8, 128>}]} {
    %c0 = arith.constant 0 : index
    %c0_0 = arith.constant 0 : index
    %0 = vector.load %arg1[%c0, %c0_0] : memref<8x32xbf16, #tpu.memory_space<vmem>>, vector<8x32xbf16>
    %c0_1 = arith.constant 0 : index
    %c0_2 = arith.constant 0 : index
    %1 = vector.load %arg2[%c0_1, %c0_2] : memref<32x128xbf16, #tpu.memory_space<vmem>>, vector<32x128xbf16>
    %cst = arith.constant dense<0.000000e+00> : vector<8x128xf32>
    %2 = tpu.matmul %0, %1, %cst {dimension_numbers = #tpu.dot_dimension_numbers<[1], [0], [0], [1], [0, 0, 1, 1], [], []>} : vector<8x32xbf16>, vector<32x128xbf16>, vector<8x128xf32> -> vector<8x128xf32>
    %c0_3 = arith.constant 0 : index
    %c0_4 = arith.constant 0 : index
    %3 = vector.load %arg3[%c0_3, %c0_4] : memref<8x1xf32, #tpu.memory_space<vmem>>, vector<8x1xf32>
    %4 = vector.broadcast %3 : vector<8x1xf32> to vector<8x128xf32>
    %5 = arith.mulf %2, %4 : vector<8x128xf32>
    %c0_5 = arith.constant 0 : index
    %c0_6 = arith.constant 0 : index
    %6 = vector.load %arg4[%c0_5, %c0_6] : memref<1x128xf32, #tpu.memory_space<vmem>>, vector<1x128xf32>
    %7 = vector.broadcast %6 : vector<1x128xf32> to vector<8x128xf32>
    %8 = arith.mulf %5, %7 : vector<8x128xf32>
    %cst_7 = arith.constant 5.000000e+00 : f32
    %9 = vector.broadcast %cst_7 : f32 to vector<8x128xf32>
    %10 = arith.mulf %8, %9 : vector<8x128xf32>
    %11 = math.exp %10 : vector<8x128xf32>
    %c0_8 = arith.constant 0 : index
    %c0_9 = arith.constant 0 : index
    %12 = vector.load %arg5[%c0_8, %c0_9] : memref<8x128xbf16, #tpu.memory_space<vmem>>, vector<8x128xbf16>
    %13 = arith.extf %12 : vector<8x128xbf16> to vector<8x128xf32>
    %14 = arith.mulf %11, %13 : vector<8x128xf32>
    %c0_10 = arith.constant 0 : index
    %c0_11 = arith.constant 0 : index
    %15 = vector.load %arg6[%c0_10, %c0_11] : memref<8x128xf32, #tpu.memory_space<vmem>>, vector<8x128xf32>
    tpu.vector_store %arg6[%c0_10, %c0_11], %14 {strides = array<i32>} : memref<8x128xf32, #tpu.memory_space<vmem>>, vector<8x128xf32>,
    return
  }
  func.func @transform_0(%arg0: i32) -> (i32, i32) {
    %c0_i32 = arith.constant 0 : i32
    %c0_i32_0 = arith.constant 0 : i32
    %c0_i32_1 = arith.constant 0 : i32
    return %c0_i32, %c0_i32_0 : i32, i32
  }
  func.func @transform_1(%arg0: i32) -> (i32, i32) {
    %c0_i32 = arith.constant 0 : i32
    %c0_i32_0 = arith.constant 0 : i32
    return %c0_i32, %arg0 : i32, i32
  }
  func.func @transform_2(%arg0: i32) -> (i32, i32) {
    %c0_i32 = arith.constant 0 : i32
    %c0_i32_0 = arith.constant 0 : i32
    %c0_i32_1 = arith.constant 0 : i32
    return %c0_i32, %c0_i32_0 : i32, i32
  }
  func.func @transform_3(%arg0: i32) -> (i32, i32) {
    %c0_i32 = arith.constant 0 : i32
    %c0_i32_0 = arith.constant 0 : i32
    return %c0_i32, %arg0 : i32, i32
  }
  func.func @transform_4(%arg0: i32) -> (i32, i32) {
    %c0_i32 = arith.constant 0 : i32
    %c0_i32_0 = arith.constant 0 : i32
    return %c0_i32, %arg0 : i32, i32
  }
  func.func @transform_5(%arg0: i32) -> (i32, i32) {
    %c0_i32 = arith.constant 0 : i32
    %c0_i32_0 = arith.constant 0 : i32
    return %c0_i32, %arg0 : i32, i32
  }
}

</mosaic_0001>

<bundles_post_ra>
// kernel: tpu_custom_call.1
= control target key start
LH: loop header
LB: loop body
LE: loop exit
PB: predicated region body
PF: predicated region fallthrough
CT: control target
= control target key end

     0   :  { %10 = vsyncpa [#allocation3], 0  ;;  %s282_s0 = inlined_call_operand.vmem [shape: bf16[8,32], index: 0, kind: input, shape index: {}]   ;;  %s283_s1 = inlined_call_operand.hbm [shape: bf16[32,128], index: 1, kind: input, shape index: {}]   ;;  %s284_s2 = inlined_call_operand.vmem [shape: f32[8,1], index: 2, kind: input, shape index: {}]   ;;  %s285_s3 = inlined_call_operand.vmem [shape: f32[1,128], index: 3, kind: input, shape index: {}]   ;;  %s286_s4 = inlined_call_operand.vmem [shape: bf16[8,128], index: 4, kind: input, shape index: {}]   ;;  %s287_s5 = inlined_call_operand.hbm [shape: f32[8,128], index: 5, kind: output, shape index: {}]  }
   0x1   :  { %11 = vsyncpa [#allocation4], 0  ;;  %s209_s18 = smov [#allocation2]   ;;  %s161_s22 = scalar_lea.hbm %s283_s1, 256 }
   0x2   :  { %s19_s19 = sshll.u32 %s209_s18, 4  ;;  %p162_p0 = scmp.ne.s32.totalorder %s283_s1, %s161_s22  ;;  %s20_s19 = int_to_ptr.vmem [resolvable:$true] %s19_s19 }
   0x3   :  { %p165_p1 = scmp.lt.u32.totalorder %s161_s22, %s283_s1 }
   0x5   :  { %p167_p2 = pnand %p165_p1, %p162_p0 }
   0x7   :  { %170 = shalt.err (!%p167_p2)
}
   0x8   :  { %s171_s27 = scalar_lea.vmem %s20_s19, 256  ;;  %p176_p4 = scmp.lt.s32.totalorder %s20_s19, %s20_s19 }
   0x9   :  { %p172_p3 = scmp.ne.s32.totalorder %s20_s19, %s171_s27  ;;  %p177_p5 = scmp.lt.s32.totalorder %s171_s27, %s171_s27 }
   0xb   :  { %p178_p6 = por %p177_p5, %p176_p4 }
   0xd   :  { %p179_p7 = pnand %p178_p6, %p172_p3 }
   0xf   :  { %182 = shalt.err (!%p179_p7)
}
  0x10   :  { %s210_s28 = smov 64   ;;  %s211_s29 = smov 4  }
  0x11   :  { %25 = dma.hbm_to_vmem [thread:$0]  %s283_s1, 256, %s20_s19, [#allocation3], %s210_s28, %s210_s28, %s211_s29  }
  0x12   :  { %205 = dma.done.wait [#allocation3], 256  }
  0x13   :  { %206 = vsyncadd [#allocation3], 4294967040  ;;  %v212_v0 = vmov 0.0   ;;  %vm213_vm0 = vmmov 0   ;;  %v214_v1 = vmov 0   ;;  %v157_v2 = vld [vmem:[#allocation2] sm:$0xff]  }
  0x14   :  { %141 = vmatprep.subr.bf16.mxu0 %v212_v0  ;;  %145 = vmatprep.mubr.msk.bf16.mxu0 %vm213_vm0, %v212_v0  ;;  %v158_v3 = vld [vmem:[#allocation2 + $0x8] sm:$0xff]   ;;  %v97_v4 = vld [vmem:[%s284_s2] sm:$0xff]  ;;  %vm53_vm1 = vcmask 261120  }
  0x15   :  { %156 = vset.pattern.permute.xlu0 %v214_v1  ;;  %142 = vmatpush3.bf16.msra.mxu0 %v157_v2  ;;  %v36_v5 = vld [vmem:[%s282_s0] sm:$0xf]  ;;  %s215_s0 = smov [#allocation5]  }
  0x16   :  { %143 = vmatprep.subr.bf16.mxu0 %v212_v0  ;;  %100 = vperm.xlu0 %156, %v97_v4   ;;  %v137_v8 = vld [vmem:[%s285_s3] ss:$0 sm:$0xff]  ;;  %s125_s13 = sshll.u32 %s215_s0, 4  ;;  %s126_s13 = int_to_ptr.vmem [resolvable:$true] %s125_s13 }
  0x17   :  { %v115_v16 = vld [vmem:[%s286_s4] sm:$0xf]  ;;  %s183_s3 = scalar_lea.vmem %s126_s13, 128  ;;  %p188_p9 = scmp.lt.s32.totalorder %s126_s13, %s126_s13 }
  0x18   :  { %v116_v17 = vunpack.c.l.bf16 %v115_v16  ;;  %p184_p8 = scmp.ne.s32.totalorder %s126_s13, %s183_s3  ;;  %p189_p10 = scmp.lt.s32.totalorder %s183_s3, %s183_s3 }
  0x19   :  { %144 = vmatpush3.bf16.msra.mxu0 %v158_v3 }
  0x1a   :  { %p190_p11 = por %p189_p10, %p188_p9 }
  0x1c   :  { %146 = vmatmul.mubr.msk.bf16.vlgmr.msra.gmra.mrb[0].mxu0 %vm53_vm1, %v36_v5  ;;  %p191_p12 = pnand %p190_p11, %p184_p8 }
  0x95   :  { %v101_v6 = vpop.permute.xlu0 %100 }
  0xef   :  { %v91_v7 = vpop.f32.mrb[0].mxu0 }
  0xf0   :  { %v103_v9 = vmul.f32 %v101_v6, %v91_v7  ;;  %v147_v10 = vpop.f32.mrb[1].mxu0 }
  0xf1   :  { %v94_v11 = vpop.f32.mrb[2].mxu0 }
  0xf2   :  { %v111_v12 = vmul.f32 %v137_v8, %v103_v9  ;;  %v148_v13 = vpop.f32.mrb[3].mxu0 }
  0xf4   :  { %v112_v14 = vmul.f32 5.0, %v111_v12 }
  0xf6   :  { %v113_v15 = vmul.f32 1.442695, %v112_v14 }
  0xf8   :  { %159 = vpow2.f32 %v113_v15 }
 0x102   :  { %v160_v18 = vpop.eup %159 }
 0x103   :  { %v117_v19 = vmul.f32 %v160_v18, %v116_v17 }
 0x105   :  { %118 = vst [vmem:[#allocation5] sm:$0xff] %v117_v19 }
 0x106   :  { %194 = shalt.err (!%p191_p12)
}
 0x107   :  { %s195_s16 = scalar_lea.hbm %s287_s5, 128 }
 0x108   :  { %p196_p13 = scmp.ne.s32.totalorder %s287_s5, %s195_s16  ;;  %p199_p0 = scmp.lt.u32.totalorder %s195_s16, %s287_s5 }
 0x10a   :  { %p201_p1 = pnand %p199_p0, %p196_p13 }
 0x10c   :  { %204 = shalt.err (!%p201_p1)
}
 0x10d   :  { %128 = dma.vmem_to_hbm [thread:$0]  %s126_s13, 128, %s287_s5, [#allocation4]  }
 0x10e   :  { %207 = dma.done.wait [#allocation4], 128  }
 0x10f   :  { %208 = vsyncadd [#allocation4], 4294967168 }
 0x110   :  { %132 = vsyncpa [#allocation3], 1 }
 0x111   :  { %133 = vsyncpa [#allocation4], 1 }

</bundles_post_ra>
